<compile_context>
chip_gen: v7x
topology: tpu7x:2x2x1
jax: 0.10.0
libtpu: 0.0.40
codegen_flags: <defaults>
</compile_context>

<pallas_src>
import jax
import jax.numpy as jnp
from jax.experimental import pallas as pl
from jax.experimental.pallas import tpu as pltpu


LANE = 128            # TPU lane width
_MIB = 1024 * 1024


def _round_up(x, m):
    return ((x + m - 1) // m) * m


def adapter_kernel(x_ref, wd_ref, wu_ref, o_ref):
    # x_ref:  (tb, H)  tile of pooled_output
    # wd_ref: (H, Ap)  resident down-projection weight (transposed, A padded)
    # wu_ref: (Ap, H)  resident up-projection weight   (transposed, A padded)
    # First matmul on the MXU in the weight compute dtype, f32 accumulation.
    h = jnp.dot(x_ref[...].astype(wd_ref.dtype), wd_ref[...],
                preferred_element_type=jnp.float32)
    # ReLU on the VPU, cast back for the second MXU pass.
    h = jnp.maximum(h, 0.0).astype(wu_ref.dtype)
    y = jnp.dot(h, wu_ref[...], preferred_element_type=jnp.float32)
    # Residual add in f32: re-read x from the resident VMEM tile (keeps the
    # f32 input out of live registers across both matmuls; ld slots have slack).
    o_ref[...] = (y + x_ref[...].astype(jnp.float32)).astype(o_ref.dtype)


def prepare_adapter_weights(w_down, w_up, *, compute_dtype=None):
    """One-time weight prep (at init, NOT per forward).

    w_down: [A, H], w_up: [H, A]  (PyTorch nn.Linear layout, bias=False).
    Returns (wd_t, wu_t): [H, Ap] and [Ap, H] with only the adapter dim zero-
    padded to a multiple of 128 (exact no-op through ReLU / matmul).
    compute_dtype=None keeps the original dtype; pass jnp.bfloat16 explicitly
    to opt into the low-precision MXU fast path (caller-controlled).
    """
    A, H = w_down.shape
    assert w_up.shape == (H, A)
    w_down = jnp.asarray(w_down)
    w_up = jnp.asarray(w_up)
    dt = w_down.dtype if compute_dtype is None else compute_dtype
    Ap = _round_up(A, LANE)
    wd_t = jnp.pad(w_down.astype(dt).T, ((0, 0), (0, Ap - A)))  # [H, Ap]
    wu_t = jnp.pad(w_up.astype(dt).T, ((0, Ap - A), (0, 0)))    # [Ap, H]
    return wd_t, wu_t


def adapter_forward(pooled_output, wd_t, wu_t, *, tb=None):
    """pooled_output: [B, H]; wd_t: [H, Ap]; wu_t: [Ap, H] (from prepare_adapter_weights)."""
    B, H = pooled_output.shape
    H_w, Ap = wd_t.shape
    assert H_w == H and wu_t.shape == (Ap, H)

    in_dtype = jnp.dtype(pooled_output.dtype)
    w_dtype = jnp.dtype(wd_t.dtype)
    in_bytes = in_dtype.itemsize
    w_bytes = w_dtype.itemsize
    out_bytes = in_bytes
    sub = max(8, 32 // in_bytes)   # sublane granularity for the input dtype

    # --- VMEM budget per generation ------------------------------------------
    try:
        vmem_cap = int(pltpu.get_tpu_info().vmem_capacity_bytes)
    except Exception:
        vmem_cap = 64 * _MIB       # conservative: v7x per-TC VMEM
    budget = (vmem_cap * 3) // 4   # headroom for compiler-internal scratch

    weight_vmem = 2 * H * Ap * w_bytes    # one resident copy of each weight
    # Per-row bytes: double-buffered x + out tiles, plus in-kernel temporaries
    # (cast x, f32 y on the hidden dim; f32 h and cast h on the adapter dim).
    per_row = (2 * H * in_bytes + 2 * H * out_bytes
               + H * (w_bytes + 4) + Ap * (w_bytes + 4))
    # TODO(synk): for adapters whose resident weights exceed the VMEM budget,
    # add a second grid axis over Ap instead of keeping both weights resident.
    assert weight_vmem < budget, "adapter weights do not fit in the VMEM budget"
    tb_cap = max(sub, ((budget - weight_vmem) // per_row) // sub * sub)

    if tb is None:
        # Fill VMEM with big tiles, but keep >= ~4 grid steps so the 'parallel'
        # batch axis can shard across v7x's two TensorCores.
        tb = min(tb_cap, _round_up(max(1, pl.cdiv(B, 4)), sub))
    tb = max(sub, min(int(tb), tb_cap))
    tb = (tb // sub) * sub

    grid = (pl.cdiv(B, tb),)       # partial last block is masked by Pallas

    vmem_needed = weight_vmem + tb * per_row + 2 * _MIB
    vmem_limit = int(min(vmem_cap, max(vmem_needed, 32 * _MIB)))

    cost = pl.CostEstimate(
        flops=4 * B * H * Ap,      # two matmuls, 2*M*K*N each
        transcendentals=0,
        bytes_accessed=B * H * (in_bytes + out_bytes) + 2 * H * Ap * w_bytes,
    )

    return pl.pallas_call(
        adapter_kernel,
        out_shape=jax.ShapeDtypeStruct((B, H), in_dtype),
        grid_spec=pltpu.PrefetchScalarGridSpec(
            num_scalar_prefetch=0,
            grid=grid,
            in_specs=[
                pl.BlockSpec((tb, H), lambda i: (i, 0)),                 # x tile per step
                pl.BlockSpec(memory_space=pltpu.MemorySpace.VMEM),       # resident wd_t
                pl.BlockSpec(memory_space=pltpu.MemorySpace.VMEM),       # resident wu_t
            ],
            out_specs=pl.BlockSpec((tb, H), lambda i: (i, 0)),
        ),
        compiler_params=pltpu.CompilerParams(
            dimension_semantics=("parallel",),
            vmem_limit_bytes=vmem_limit,
        ),
        cost_estimate=cost,
    )(pooled_output, wd_t, wu_t)


def adapter_ref(pooled_output, w_down, w_up):
    x = pooled_output @ w_down.T
    x = jnp.maximum(x, 0.0)
    x = x @ w_up.T
    return x + pooled_output


if __name__ == "__main__":
    # Small shapes consistent with the module: batch=8, hidden=32, adapter=16.
    B, H, A = 8, 32, 16
    key = jax.random.PRNGKey(0)
    kx, kd, ku = jax.random.split(key, 3)

    pooled_output = jax.random.normal(kx, (B, H), dtype=jnp.float32)
    # Deterministic "Linear" weights (no bias, matching the module).
    w_down = jax.random.normal(kd, (A, H), dtype=jnp.float32) * (1.0 / jnp.sqrt(H))
    w_up = jax.random.normal(ku, (H, A), dtype=jnp.float32) * (1.0 / jnp.sqrt(A))

    # One-time weight preparation (transpose + adapter-dim lane padding).
    # compute_dtype is left at None -> weights stay f32 (caller may opt into bf16).
    wd_t, wu_t = prepare_adapter_weights(w_down, w_up)

    out = adapter_forward(pooled_output, wd_t, wu_t)
    out = jax.block_until_ready(out)

    ref = adapter_ref(pooled_output, w_down, w_up)
    assert out.shape == (B, H)
    assert out.dtype == pooled_output.dtype
    # f32 weights; MXU f32 matmul uses multi-pass bf16 internally -> modest tolerance.
    assert jnp.allclose(out, ref, atol=1e-2, rtol=1e-2), "mismatch vs reference"

    print("KERNEL_OK")
</pallas_src>

<mosaic_0001>
module attributes {stable_mosaic.version = 11 : i64} {
  func.func @adapter_kernel(%arg0: i32, %arg1: memref<8x32xf32, #tpu.memory_space<vmem>>, %arg2: memref<32x128xf32, #tpu.memory_space<vmem>>, %arg3: memref<128x32xf32, #tpu.memory_space<vmem>>, %arg4: memref<8x32xf32, #tpu.memory_space<vmem>>) attributes {dimension_semantics = [#tpu.dimension_semantics<parallel>], iteration_bounds = array<i64: 1>, scalar_prefetch = 0 : i64, scratch_operands = 0 : i64, tpu.core_type = #tpu.core_type<tc>, window_params = [{transform_indices = @transform_0, window_bounds = array<i64: 8, 32>}, {pipeline_mode = #tpu.pipeline_mode<synchronous>, transform_indices = @transform_1, window_bounds = array<i64: 32, 128>}, {pipeline_mode = #tpu.pipeline_mode<synchronous>, transform_indices = @transform_2, window_bounds = array<i64: 128, 32>}, {transform_indices = @transform_3, window_bounds = array<i64: 8, 32>}]} {
    %c0 = arith.constant 0 : index
    %c0_0 = arith.constant 0 : index
    %0 = vector.load %arg1[%c0, %c0_0] : memref<8x32xf32, #tpu.memory_space<vmem>>, vector<8x32xf32>
    %c0_1 = arith.constant 0 : index
    %c0_2 = arith.constant 0 : index
    %1 = vector.load %arg2[%c0_1, %c0_2] : memref<32x128xf32, #tpu.memory_space<vmem>>, vector<32x128xf32>
    %cst = arith.constant dense<0.000000e+00> : vector<8x128xf32>
    %2 = tpu.matmul %0, %1, %cst {dimension_numbers = #tpu.dot_dimension_numbers<[1], [0], [0], [1], [0, 0, 1, 1], [], []>} : vector<8x32xf32>, vector<32x128xf32>, vector<8x128xf32> -> vector<8x128xf32>
    %cst_3 = arith.constant 0.000000e+00 : f32
    %3 = vector.broadcast %cst_3 : f32 to vector<8x128xf32>
    %4 = arith.maximumf %2, %3 : vector<8x128xf32>
    %c0_4 = arith.constant 0 : index
    %c0_5 = arith.constant 0 : index
    %5 = vector.load %arg3[%c0_4, %c0_5] : memref<128x32xf32, #tpu.memory_space<vmem>>, vector<128x32xf32>
    %cst_6 = arith.constant dense<0.000000e+00> : vector<8x32xf32>
    %6 = tpu.matmul %4, %5, %cst_6 {dimension_numbers = #tpu.dot_dimension_numbers<[1], [0], [0], [1], [0, 0, 1, 1], [], []>} : vector<8x128xf32>, vector<128x32xf32>, vector<8x32xf32> -> vector<8x32xf32>
    %c0_7 = arith.constant 0 : index
    %c0_8 = arith.constant 0 : index
    %7 = vector.load %arg1[%c0_7, %c0_8] : memref<8x32xf32, #tpu.memory_space<vmem>>, vector<8x32xf32>
    %8 = arith.addf %6, %7 : vector<8x32xf32>
    %c0_9 = arith.constant 0 : index
    %c0_10 = arith.constant 0 : index
    %9 = vector.load %arg4[%c0_9, %c0_10] : memref<8x32xf32, #tpu.memory_space<vmem>>, vector<8x32xf32>
    tpu.vector_store %arg4[%c0_9, %c0_10], %8 {strides = array<i32>} : memref<8x32xf32, #tpu.memory_space<vmem>>, vector<8x32xf32>,
    return
  }
  func.func @transform_0(%arg0: i32) -> (i32, i32) {
    %c0_i32 = arith.constant 0 : i32
    %c0_i32_0 = arith.constant 0 : i32
    return %arg0, %c0_i32 : i32, i32
  }
  func.func @transform_1(%arg0: i32) -> (i32, i32) {
    %c0_i32 = arith.constant 0 : i32
    %c0_i32_0 = arith.constant 0 : i32
    %c0_i32_1 = arith.constant 0 : i32
    return %c0_i32, %c0_i32_0 : i32, i32
  }
  func.func @transform_2(%arg0: i32) -> (i32, i32) {
    %c0_i32 = arith.constant 0 : i32
    %c0_i32_0 = arith.constant 0 : i32
    %c0_i32_1 = arith.constant 0 : i32
    return %c0_i32, %c0_i32_0 : i32, i32
  }
  func.func @transform_3(%arg0: i32) -> (i32, i32) {
    %c0_i32 = arith.constant 0 : i32
    %c0_i32_0 = arith.constant 0 : i32
    return %arg0, %c0_i32 : i32, i32
  }
}

</mosaic_0001>

<bundles_post_ra>
// kernel: tpu_custom_call.1
= control target key start
LH: loop header
LB: loop body
LE: loop exit
PB: predicated region body
PF: predicated region fallthrough
CT: control target
= control target key end

     0   :  { %v323_v3 = vmov 0.0|0.0   ;;  %vm324_vm0 = vmmov 0   ;;  %v325_v6 = vmov 0.0   ;;  %s424_s0 = inlined_call_operand.vmem [shape: f32[8,32], index: 0, kind: input, shape index: {}]   ;;  %s425_s1 = inlined_call_operand.vmem [shape: f32[32,128], index: 1, kind: input, shape index: {}]   ;;  %s426_s2 = inlined_call_operand.vmem [shape: f32[128,32], index: 2, kind: input, shape index: {}]   ;;  %s427_s3 = inlined_call_operand.hbm [shape: f32[8,32], index: 3, kind: output, shape index: {}]  }
   0x1   :  { %v16_v0 = vld [vmem:[%s425_s1] sm:$0xff]  ;;  %v17_v1 = vld [vmem:[%s425_s1 + $0x8] sm:$0xff]  ;;  %v18_v2 = vld [vmem:[%s425_s1 + $0x10] sm:$0xff]  ;;  %265 = vmatprep.subr.bf16.mxu0 %v323_v3  ;;  %227 = vmatprep.mubr.msk.f32.mxu0 %vm324_vm0, %v325_v6 }
   0x2   :  { %v266_v4 = vpack.c.bf16 %v17_v1, %v16_v0  ;;  %v19_v5 = vld [vmem:[%s425_s1 + $0x18] sm:$0xff]  ;;  %v95_v7 = vld [vmem:[%s426_s2] sm:$0xff]  ;;  %271 = vmatprep.subr.bf16.mxu1 %v323_v3  ;;  %v96_v8 = vld [vmem:[%s426_s2 + $0x8] sm:$0xff]  ;;  %262 = vmatprep.mubr.msk.f32.mxu1 %vm324_vm0, %v325_v6 }
   0x3   :  { %v97_v9 = vld [vmem:[%s426_s2 + $0x10] sm:$0xff]  ;;  %v98_v10 = vld [vmem:[%s426_s2 + $0x18] sm:$0xff]  ;;  %v269_v11 = vpack.c.bf16 %v19_v5, %v18_v2  ;;  %v272_v12 = vpack.c.bf16 %v96_v8, %v95_v7  ;;  %v99_v14 = vld [vmem:[%s426_s2 + $0x20] sm:$0xff] }
   0x4   :  { %267 = vmatpush3.bf16.msra.mxu0 %v266_v4  ;;  %v275_v13 = vpack.c.bf16 %v98_v10, %v97_v9  ;;  %v100_v15 = vld [vmem:[%s426_s2 + $0x28] sm:$0xff] }
   0x5   :  { %268 = vmatprep.subr.bf16.mxu0 %v323_v3  ;;  %273 = vmatpush3.bf16.msra.mxu1 %v272_v12 }
   0x6   :  { %274 = vmatprep.subr.bf16.mxu1 %v323_v3 }
   0x7   :  { %8 = vsyncpa [#allocation3], 0  ;;  %v15_v16 = vld [vmem:[%s424_s0] sm:$0xff]  ;;  %vm20_vm1 = vcmask 261120   ;;  %v278_v17 = vpack.c.bf16 %v100_v15, %v99_v14  ;;  %v101_v18 = vld [vmem:[%s426_s2 + $0x30] sm:$0xff]  ;;  %s326_s25 = smov [#allocation2]  }
   0x8   :  { %270 = vmatpush3.bf16.msra.mxu0 %v269_v11  ;;  %v102_v19 = vld [vmem:[%s426_s2 + $0x38] sm:$0xff]  ;;  %v103_v21 = vld [vmem:[%s426_s2 + $0x40] sm:$0xff]  ;;  %v104_v22 = vld [vmem:[%s426_s2 + $0x48] sm:$0xff]  ;;  %s188_s26 = sshll.u32 %s326_s25, 4  ;;  %s189_s26 = int_to_ptr.vmem [resolvable:$true] %s188_s26 }
   0x9   :  { %276 = vmatpush3.bf16.msra.mxu1 %v275_v13  ;;  %v281_v20 = vpack.c.bf16 %v102_v19, %v101_v18  ;;  %v284_v23 = vpack.c.bf16 %v104_v22, %v103_v21  ;;  %v105_v24 = vld [vmem:[%s426_s2 + $0x50] sm:$0xff]  ;;  %v106_v25 = vld [vmem:[%s426_s2 + $0x58] sm:$0xff]  ;;  %v107_v27 = vld [vmem:[%s426_s2 + $0x60] sm:$0xff]  ;;  %s299_s27 = scalar_lea.vmem %s189_s26, 128  ;;  %p304_p1 = scmp.lt.s32.totalorder %s189_s26, %s189_s26 }
   0xa   :  { %277 = vmatprep.subr.bf16.mxu1 %v323_v3  ;;  %v287_v26 = vpack.c.bf16 %v106_v25, %v105_v24  ;;  %v108_v28 = vld [vmem:[%s426_s2 + $0x68] sm:$0xff]  ;;  %v109_v30 = vld [vmem:[%s426_s2 + $0x70] sm:$0xff]  ;;  %v110_v31 = vld [vmem:[%s426_s2 + $0x78] sm:$0xff]  ;;  %p300_p0 = scmp.ne.s32.totalorder %s189_s26, %s299_s27  ;;  %p305_p2 = scmp.lt.s32.totalorder %s299_s27, %s299_s27 }
   0xb   :  { %228 = vmatmul.mubr.msk.f32.vlgmr.msra.gmra.mrb[0].mxu0 %vm20_vm1, %v15_v16  ;;  %v290_v29 = vpack.c.bf16 %v108_v28, %v107_v27  ;;  %v293_v32 = vpack.c.bf16 %v110_v31, %v109_v30 }
   0xc   :  { %p306_p3 = por %p305_p2, %p304_p1 }
   0xd   :  { %279 = vmatpush3.bf16.msra.mxu1 %v278_v17 }
   0xe   :  { %280 = vmatprep.subr.bf16.mxu1 %v323_v3  ;;  %p307_p4 = pnand %p306_p3, %p300_p0 }
  0x11   :  { %282 = vmatpush3.bf16.msra.mxu1 %v281_v20 }
  0x12   :  { %283 = vmatprep.subr.bf16.mxu1 %v323_v3 }
  0x15   :  { %285 = vmatpush3.bf16.msra.mxu1 %v284_v23 }
  0x16   :  { %286 = vmatprep.subr.bf16.mxu1 %v323_v3 }
  0x19   :  { %288 = vmatpush3.bf16.msra.mxu1 %v287_v26 }
  0x1a   :  { %289 = vmatprep.subr.bf16.mxu1 %v323_v3 }
  0x1d   :  { %291 = vmatpush3.bf16.msra.mxu1 %v290_v29 }
  0x1e   :  { %292 = vmatprep.subr.bf16.mxu1 %v323_v3 }
  0x21   :  { %294 = vmatpush3.bf16.msra.mxu1 %v293_v32 }
  0xde   :  { %v90_v33 = vpop.f32.mrb[0].mxu0 }
  0xdf   :  { %v94_v34 = vmax.f32 %v90_v33, 0.0  ;;  %v229_v35 = vpop.f32.mrb[1].mxu0 }
  0xe1   :  { %263 = vmatmul.mubr.f32.vlgmr.msra.gmra.mrb[0].mxu1 %v94_v34 }
 0x1b4   :  { %v177_v36 = vpop.f32.mrb[0].mxu1 }
 0x1b5   :  { %v178_v37 = vadd.f32 %v177_v36, %v15_v16  ;;  %v264_v38 = vpop.f32.mrb[1].mxu1 }
 0x1b7   :  { %181 = vst.msk [vmem:[#allocation2] sm:$0xff] %vm20_vm1, %v178_v37 }
 0x1b8   :  { %310 = shalt.err (!%p307_p4)
}
 0x1b9   :  { %s311_s28 = scalar_lea.hbm %s427_s3, 128 }
 0x1ba   :  { %p312_p5 = scmp.ne.s32.totalorder %s427_s3, %s311_s28  ;;  %p315_p6 = scmp.lt.u32.totalorder %s311_s28, %s427_s3 }
 0x1bc   :  { %p317_p7 = pnand %p315_p6, %p312_p5 }
 0x1be   :  { %320 = shalt.err (!%p317_p7)
}
 0x1bf   :  { %191 = dma.vmem_to_hbm [thread:$0]  %s189_s26, 128, %s427_s3, [#allocation3]  }
 0x1c0   :  { %321 = dma.done.wait [#allocation3], 128  }
 0x1c1   :  { %322 = vsyncadd [#allocation3], 4294967168 }
 0x1c2   :  { %195 = vsyncpa [#allocation3], 1 }

</bundles_post_ra>
